<compile_context>
chip_gen: v7x
topology: tpu7x:2x2x1
jax: 0.10.0
libtpu: 0.0.40
codegen_flags: <defaults>
</compile_context>

<pallas_src>
import jax
import jax.numpy as jnp
from jax.experimental import pallas as pl
from jax.experimental.pallas import tpu as pltpu  # noqa: F401  (TPU backend)

_LANES = 128
_SUBLANES = 8


def _softmax_slab_kernel(w_ref, o_ref):
    """Softmax over ALL elements of a dense (R, 128) slab (padded with -inf)."""
    w = w_ref[...].astype(jnp.float32)  # keep f32 math (v5e EUP has no bf16)

    # Global max: lane reduce then sublane reduce (both XLU, off the VPU slot).
    m = jnp.max(jnp.max(w, axis=-1, keepdims=True), axis=0, keepdims=True)  # (1,1)
    e = jnp.exp(w - m)                           # padded lanes -> exp(-inf) = 0
    s = jnp.sum(jnp.sum(e, axis=-1, keepdims=True), axis=0, keepdims=True)  # (1,1)

    # Approx reciprocal (single EUP push) + one Newton step (pure VPU) on the
    # scalar denominator; per-element normalize becomes a VPU multiply.
    inv = pl.reciprocal(s, approx=True)
    inv = inv * (2.0 - s * inv)
    o_ref[...] = (e * inv).astype(o_ref.dtype)


def _softmax_rows_kernel(w_ref, o_ref):
    """Row-wise softmax of a (B, Fp) block; rows are -inf padded on the lane axis."""
    w = w_ref[...].astype(jnp.float32)
    m = jnp.max(w, axis=-1, keepdims=True)       # (B, 1)
    e = jnp.exp(w - m)
    s = jnp.sum(e, axis=-1, keepdims=True)       # (B, 1)
    inv = pl.reciprocal(s, approx=True)
    inv = inv * (2.0 - s * inv)
    o_ref[...] = (e * inv).astype(o_ref.dtype)


def adaptive_weights_forward(weights):
    """weights: (num_features,) -> softmax(weights, axis=0), shape (num_features,)."""
    (num_features,) = weights.shape

    # Pack into a dense, fully lane/sublane-aligned (R, 128) slab padded with
    # -inf (padded entries are exact zeros after the softmax and are sliced off).
    slab = _LANES * _SUBLANES                                  # 1024 elements
    padded = pl.cdiv(num_features, slab) * slab
    rows = padded // _LANES
    w_pad = jnp.pad(weights, (0, padded - num_features),
                    constant_values=-jnp.inf)
    w2d = w_pad.reshape(rows, _LANES)

    out2d = pl.pallas_call(
        _softmax_slab_kernel,
        out_shape=jax.ShapeDtypeStruct((rows, _LANES), weights.dtype),
        # Block == full array, single invocation (no grid): the only remaining
        # cost is the unavoidable launch + tiny DMA.
        in_specs=[pl.BlockSpec((rows, _LANES), lambda: (0, 0))],
        out_specs=pl.BlockSpec((rows, _LANES), lambda: (0, 0)),
    )(w2d)

    return out2d.reshape(padded)[:num_features]


def adaptive_weights_forward_batched(weights_2d):
    """weights_2d: (B, num_features) -> row-wise softmax, same shape.

    Fuses B independent AdaptiveWeights forward passes into a single
    pallas_call, amortizing per-call launch/DMA overhead across rows.
    """
    batch, num_features = weights_2d.shape
    padded_f = pl.cdiv(num_features, _LANES) * _LANES
    w_pad = jnp.pad(weights_2d, ((0, 0), (0, padded_f - num_features)),
                    constant_values=-jnp.inf)

    out = pl.pallas_call(
        _softmax_rows_kernel,
        out_shape=jax.ShapeDtypeStruct((batch, padded_f), weights_2d.dtype),
        in_specs=[pl.BlockSpec((batch, padded_f), lambda: (0, 0))],
        out_specs=pl.BlockSpec((batch, padded_f), lambda: (0, 0)),
    )(w_pad)

    return out[:, :num_features]


if __name__ == "__main__":
    key = jax.random.PRNGKey(0)
    num_features = 16

    # PyTorch initializes the parameter to ones (softmax of ones is uniform);
    # use deterministic random values here to exercise the softmax — forward
    # semantics are identical for any parameter value.
    weights = jax.random.normal(key, (num_features,), dtype=jnp.float32)

    out = adaptive_weights_forward(weights)
    jax.block_until_ready(out)

    ref = jax.nn.softmax(weights, axis=0)
    assert out.shape == (num_features,)
    assert jnp.allclose(out, ref, atol=1e-5, rtol=1e-5)
    assert abs(float(jnp.sum(out)) - 1.0) < 1e-5

    # Batched path: several AdaptiveWeights instances evaluated in one call.
    wb = jax.random.normal(jax.random.PRNGKey(1), (4, num_features),
                           dtype=jnp.float32)
    outb = adaptive_weights_forward_batched(wb)
    jax.block_until_ready(outb)
    refb = jax.nn.softmax(wb, axis=-1)
    assert outb.shape == wb.shape
    assert jnp.allclose(outb, refb, atol=1e-5, rtol=1e-5)

    print("KERNEL_OK")
</pallas_src>

<mosaic_0001>
module attributes {stable_mosaic.version = 11 : i64} {
  func.func @_softmax_slab_kernel(%arg0: memref<8x128xf32, #tpu.memory_space<vmem>>, %arg1: memref<8x128xf32, #tpu.memory_space<vmem>>) attributes {dimension_semantics = [], scalar_prefetch = 0 : i64, scratch_operands = 0 : i64, tpu.core_type = #tpu.core_type<tc>} {
    %c0 = arith.constant 0 : index
    %c0_0 = arith.constant 0 : index
    %0 = vector.load %arg0[%c0, %c0_0] : memref<8x128xf32, #tpu.memory_space<vmem>>, vector<8x128xf32>
    %cst = arith.constant dense<0xFF800000> : vector<8xf32>
    %1 = vector.multi_reduction <maximumf>, %0, %cst [1] : vector<8x128xf32> to vector<8xf32>
    %2 = vector.shape_cast %1 : vector<8xf32> to vector<8x1xf32>
    %cst_1 = arith.constant dense<0xFF800000> : vector<1xf32>
    %3 = vector.multi_reduction <maximumf>, %2, %cst_1 [0] : vector<8x1xf32> to vector<1xf32>
    %4 = vector.shape_cast %3 : vector<1xf32> to vector<1x1xf32>
    %5 = vector.broadcast %4 : vector<1x1xf32> to vector<8x128xf32>
    %6 = arith.subf %0, %5 : vector<8x128xf32>
    %7 = math.exp %6 : vector<8x128xf32>
    %cst_2 = arith.constant dense<0.000000e+00> : vector<8xf32>
    %8 = vector.multi_reduction <add>, %7, %cst_2 [1] : vector<8x128xf32> to vector<8xf32>
    %9 = vector.shape_cast %8 : vector<8xf32> to vector<8x1xf32>
    %cst_3 = arith.constant dense<0.000000e+00> : vector<1xf32>
    %10 = vector.multi_reduction <add>, %9, %cst_3 [0] : vector<8x1xf32> to vector<1xf32>
    %11 = vector.shape_cast %10 : vector<1xf32> to vector<1x1xf32>
    %12 = tpu.reciprocal %11 {approx = true} : vector<1x1xf32> -> vector<1x1xf32>
    %13 = arith.mulf %11, %12 : vector<1x1xf32>
    %cst_4 = arith.constant 2.000000e+00 : f32
    %14 = vector.broadcast %cst_4 : f32 to vector<1x1xf32>
    %15 = arith.subf %14, %13 : vector<1x1xf32>
    %16 = arith.mulf %12, %15 : vector<1x1xf32>
    %17 = vector.broadcast %16 : vector<1x1xf32> to vector<8x128xf32>
    %18 = arith.mulf %7, %17 : vector<8x128xf32>
    %c0_5 = arith.constant 0 : index
    %c0_6 = arith.constant 0 : index
    %19 = vector.load %arg1[%c0_5, %c0_6] : memref<8x128xf32, #tpu.memory_space<vmem>>, vector<8x128xf32>
    tpu.vector_store %arg1[%c0_5, %c0_6], %18 {strides = array<i32>} : memref<8x128xf32, #tpu.memory_space<vmem>>, vector<8x128xf32>,
    return
  }
}

</mosaic_0001>

<bundles_post_ra>
// kernel: tpu_custom_call.1
= control target key start
LH: loop header
LB: loop body
LE: loop exit
PB: predicated region body
PF: predicated region fallthrough
CT: control target
= control target key end

     0   :  { %6 = vsyncpa [#allocation3], 0  ;;  %s152_s0 = inlined_call_operand.hbm [shape: f32[8,128], index: 0, kind: input, shape index: {}]   ;;  %s153_s1 = inlined_call_operand.hbm [shape: f32[8,128], index: 1, kind: output, shape index: {}]  }
   0x1   :  { %7 = vsyncpa [#allocation4], 0  ;;  %s116_s6 = smov [#allocation2]   ;;  %s68_s10 = scalar_lea.hbm %s152_s0, 128 }
   0x2   :  { %s14_s7 = sshll.u32 %s116_s6, 4  ;;  %p69_p0 = scmp.ne.s32.totalorder %s152_s0, %s68_s10  ;;  %s15_s7 = int_to_ptr.vmem [resolvable:$true] %s14_s7 }
   0x3   :  { %p72_p1 = scmp.lt.u32.totalorder %s68_s10, %s152_s0 }
   0x5   :  { %p74_p2 = pnand %p72_p1, %p69_p0 }
   0x7   :  { %77 = shalt.err (!%p74_p2)
}
   0x8   :  { %s78_s15 = scalar_lea.vmem %s15_s7, 128  ;;  %p83_p4 = scmp.lt.s32.totalorder %s15_s7, %s15_s7 }
   0x9   :  { %p79_p3 = scmp.ne.s32.totalorder %s15_s7, %s78_s15  ;;  %p84_p5 = scmp.lt.s32.totalorder %s78_s15, %s78_s15 }
   0xb   :  { %p85_p6 = por %p84_p5, %p83_p4 }
   0xd   :  { %p86_p7 = pnand %p85_p6, %p79_p3 }
   0xf   :  { %89 = shalt.err (!%p86_p7)
}
  0x10   :  { %17 = dma.hbm_to_vmem [thread:$0]  %s152_s0, 128, %s15_s7, [#allocation3]  }
  0x11   :  { %112 = dma.done.wait [#allocation3], 128  }
  0x12   :  { %113 = vsyncadd [#allocation3], 4294967168  ;;  %v21_v0 = vld [vmem:[#allocation2] sm:$0xff]  ;;  %s117_s0 = smov [#allocation5]  }
  0x13   :  { %22 = vmax.xlane.f32.xlu0 %v21_v0  ;;  %s53_s18 = sshll.u32 %s117_s0, 4  ;;  %s54_s18 = int_to_ptr.vmem [resolvable:$true] %s53_s18 }
  0x14   :  { %s90_s19 = scalar_lea.vmem %s54_s18, 128  ;;  %p95_p9 = scmp.lt.s32.totalorder %s54_s18, %s54_s18 }
  0x15   :  { %p91_p8 = scmp.ne.s32.totalorder %s54_s18, %s90_s19  ;;  %p96_p10 = scmp.lt.s32.totalorder %s90_s19, %s90_s19 }
  0x17   :  { %p97_p11 = por %p96_p10, %p95_p9 }
  0x19   :  { %p98_p12 = pnand %p97_p11, %p91_p8 }
  0xa0   :  { %v23_v1 = vpop.xlane.xlu0 %22 }
  0xa1   :  { %v24_v2 = vrot.slane %v23_v1, 4 }
  0xa3   :  { %v25_v3 = vmax.f32 %v23_v1, %v24_v2 }
  0xa5   :  { %v26_v4 = vrot.slane %v25_v3, 2 }
  0xa7   :  { %v27_v5 = vmax.f32 %v25_v3, %v26_v4 }
  0xa9   :  { %v28_v6 = vrot.slane %v27_v5, 1 }
  0xab   :  { %v29_v7 = vmax.f32 %v27_v5, %v28_v6 }
  0xad   :  { %v30_v8 = vsub.f32 %v21_v0, %v29_v7 }
  0xaf   :  { %v31_v9 = vmul.f32 1.442695, %v30_v8 }
  0xb1   :  { %64 = vpow2.f32 %v31_v9 }
  0xbb   :  { %v65_v10 = vpop.eup %64 }
  0xbc   :  { %33 = vadd.xlane.f32.xlu0 %v65_v10 }
 0x149   :  { %v34_v11 = vpop.xlane.xlu0 %33 }
 0x14a   :  { %v35_v12 = vrot.slane %v34_v11, 4 }
 0x14c   :  { %v36_v13 = vadd.f32 %v35_v12, %v34_v11 }
 0x14e   :  { %v37_v14 = vrot.slane %v36_v13, 2 }
 0x150   :  { %v38_v15 = vadd.f32 %v37_v14, %v36_v13 }
 0x152   :  { %v39_v16 = vrot.slane %v38_v15, 1 }
 0x154   :  { %v40_v17 = vadd.f32 %v39_v16, %v38_v15 }
 0x156   :  { %66 = vrcp.f32 %v40_v17 }
 0x160   :  { %v67_v18 = vpop.eup %66 }
 0x161   :  { %v42_v19 = vmul.f32 %v67_v18, %v40_v17 }
 0x163   :  { %v43_v20 = vsub.f32 2.0, %v42_v19 }
 0x165   :  { %v44_v21 = vmul.f32 %v67_v18, %v43_v20 }
 0x167   :  { %v45_v22 = vmul.f32 %v65_v10, %v44_v21 }
 0x169   :  { %46 = vst [vmem:[#allocation5] sm:$0xff] %v45_v22 }
 0x16a   :  { %101 = shalt.err (!%p98_p12)
}
 0x16b   :  { %s102_s22 = scalar_lea.hbm %s153_s1, 128 }
 0x16c   :  { %p103_p13 = scmp.ne.s32.totalorder %s153_s1, %s102_s22  ;;  %p106_p0 = scmp.lt.u32.totalorder %s102_s22, %s153_s1 }
 0x16e   :  { %p108_p1 = pnand %p106_p0, %p103_p13 }
 0x170   :  { %111 = shalt.err (!%p108_p1)
}
 0x171   :  { %56 = dma.vmem_to_hbm [thread:$0]  %s54_s18, 128, %s153_s1, [#allocation4]  }
 0x172   :  { %114 = dma.done.wait [#allocation4], 128  }
 0x173   :  { %115 = vsyncadd [#allocation4], 4294967168 }
 0x174   :  { %60 = vsyncpa [#allocation3], 1 }
 0x175   :  { %61 = vsyncpa [#allocation4], 1 }

</bundles_post_ra>
